<compile_context>
chip_gen: v7x
topology: tpu7x:2x2x1
jax: 0.10.0
libtpu: 0.0.40
codegen_flags: <defaults>
</compile_context>

<pallas_src>
import math

import jax
import jax.numpy as jnp
from jax.experimental import pallas as pl
from jax.experimental.pallas import tpu as pltpu


# ---------------------------------------------------------------------------
# Parameter packing (wrapper-side, one-time cost in real usage).
# Slab layout, rows of a (48, 128) f32 array:
#   [ 0: 4)  w1        (4, 4)
#   [ 8:12)  w2_folded (4, 18)   = W2(48,18).reshape(12,4,18).sum(0)
#   [16:34)  w3        (18, 2)
#   [40:41)  w4        (1, 6)
#   [41:42)  b1        (1, 4)
#   [42:43)  b2        (1, 18)
#   [43:44)  b3        (1, 2)
#   [44:45)  b4        (1, 6)
# ---------------------------------------------------------------------------
def pack_params(params):
    (w1, b1), (w2, b2), (w3, b3), (w4, b4) = params
    # Fold tile(h,(1,12)) @ W2  ->  h @ sum of the 12 (4,18) row blocks of W2.
    w2_folded = w2.reshape(12, 4, 18).sum(axis=0)
    slab = jnp.zeros((48, 128), jnp.float32)
    slab = slab.at[0:4, 0:4].set(w1)
    slab = slab.at[8:12, 0:18].set(w2_folded)
    slab = slab.at[16:34, 0:2].set(w3)
    slab = slab.at[40:41, 0:6].set(w4)
    slab = slab.at[41:42, 0:4].set(b1)
    slab = slab.at[42:43, 0:18].set(b2)
    slab = slab.at[43:44, 0:2].set(b3)
    slab = slab.at[44:45, 0:6].set(b4)
    return slab


# ---------------------------------------------------------------------------
# Kernel
# ---------------------------------------------------------------------------
def mlp_kernel(x_ref, p_ref, o_ref):
    x = x_ref[...]                      # (B, 4)
    B = x.shape[0]

    # Static slices of the packed parameter slab (no extra DMAs).
    w1 = p_ref[0:4, 0:4]
    w2 = p_ref[8:12, 0:18]              # pre-folded (4, 18)
    w3 = p_ref[16:34, 0:2]
    w4 = p_ref[40:41, 0:6]
    b1 = p_ref[41:42, 0:4]
    b2 = p_ref[42:43, 0:18]
    b3 = p_ref[43:44, 0:2]
    b4 = p_ref[44:45, 0:6]

    # layers1 + relu
    h = jnp.maximum(jnp.dot(x, w1, preferred_element_type=jnp.float32) + b1, 0.0)

    # cat((x,x),1); relu; cat((x,)*6,1); relu; layers2; relu
    # -> folded: the relus after the concats are identities on a non-negative
    #    tensor, and the concat+matmul collapses into the pre-summed w2.
    # TODO(synk): original module declares Linear(4, 18) which cannot consume
    # the 48-wide concat; in_features treated as 48 (then folded back to 4).
    h = jnp.maximum(jnp.dot(h, w2, preferred_element_type=jnp.float32) + b2, 0.0)

    # layers3
    h = jnp.dot(h, w3, preferred_element_type=jnp.float32) + b3        # (B, 2)

    # max_pool2d(k=2, s=1) on a width-2 map: column max + adjacent-row max.
    # TODO(synk): PyTorch max_pool2d rejects rank-2 input; the (batch, feature)
    # matrix is interpreted as a single-channel 2-D spatial map.
    h = jnp.max(h, axis=1, keepdims=True)                              # (B, 1)
    h = jnp.maximum(h[:-1, :], h[1:, :])                               # (B-1, 1)

    # layers4
    # TODO(synk): declared Linear(2, 6) but pooled width is 1; in_features
    # adjusted to 1.  With K == 1 the matmul is an exact broadcast multiply.
    h = h * w4 + b4                                                    # (B-1, 6)

    # max_pool2d(k=2, s=1): separable adjacent-column max + adjacent-row max.
    h = jnp.maximum(h[:, :-1], h[:, 1:])                               # (B-1, 5)
    h = jnp.maximum(h[:-1, :], h[1:, :])                               # (B-2, 5)

    o_ref[...] = h.astype(o_ref.dtype)


# ---------------------------------------------------------------------------
# Wrapper
# ---------------------------------------------------------------------------
def model_forward(x, params):
    B = x.shape[0]
    if B < 3:
        raise ValueError(
            f"batch={B} too small: two stride-1 pools along the batch axis "
            "need B >= 3 to produce a non-empty output")
    slab = pack_params(params)   # in real usage this would be cached per-model
    vmem = pl.BlockSpec(memory_space=pltpu.MemorySpace.VMEM)
    return pl.pallas_call(
        mlp_kernel,
        out_shape=jax.ShapeDtypeStruct((B - 2, 5), jnp.float32),
        in_specs=[vmem, vmem],
        out_specs=vmem,
    )(x, slab)


# ---------------------------------------------------------------------------
# Pure-JAX reference: the literal (un-folded) forward, used to validate the
# algebraic simplifications done in the kernel/wrapper.
# ---------------------------------------------------------------------------
def _reference_forward(x, params):
    (w1, b1), (w2, b2), (w3, b3), (w4, b4) = params

    def pool(a):  # F.max_pool2d(kernel_size=2, stride=1) on an (H, W) map
        return jnp.maximum(jnp.maximum(a[:-1, :-1], a[1:, :-1]),
                           jnp.maximum(a[:-1, 1:], a[1:, 1:]))

    h = jnp.maximum(x @ w1 + b1, 0.0)
    h = jnp.maximum(jnp.tile(h, (1, 2)), 0.0)
    h = jnp.maximum(jnp.tile(h, (1, 6)), 0.0)
    h = jnp.maximum(h @ w2 + b2, 0.0)
    h = h @ w3 + b3
    h = pool(h)
    h = h @ w4 + b4
    h = pool(h)
    return h


def init_linear(key, fan_in, fan_out):
    """Deterministic PyTorch-style uniform init; weight stored as (in, out)."""
    kw, kb = jax.random.split(key)
    bound = 1.0 / math.sqrt(fan_in)
    w = jax.random.uniform(kw, (fan_in, fan_out), jnp.float32, -bound, bound)
    b = jax.random.uniform(kb, (1, fan_out), jnp.float32, -bound, bound)
    return w, b


if __name__ == "__main__":
    key = jax.random.PRNGKey(0)
    kx, k1, k2, k3, k4 = jax.random.split(key, 5)

    # Batch enlarged from the snippet's 2 to 8 so the two stride-1 pools along
    # the batch axis do not produce an empty tensor.
    B = 8
    x = jax.random.normal(kx, (B, 4), jnp.float32)

    params = (
        init_linear(k1, 4, 4),     # layers1: Linear(4, 4)
        init_linear(k2, 48, 18),   # layers2: Linear(48, 18)  (see TODO above)
        init_linear(k3, 18, 2),    # layers3: Linear(18, 2)
        init_linear(k4, 1, 6),     # layers4: Linear(1, 6)    (see TODO above)
    )

    out = jax.block_until_ready(model_forward(x, params))

    ref = _reference_forward(x, params)
    assert out.shape == (B - 2, 5), out.shape
    assert jnp.allclose(out, ref, atol=1e-4, rtol=1e-4), "mismatch vs reference"

    print("KERNEL_OK")
</pallas_src>

<mosaic_0001>
module attributes {stable_mosaic.version = 11 : i64} {
  func.func @mlp_kernel(%arg0: memref<8x4xf32, #tpu.memory_space<vmem>>, %arg1: memref<48x128xf32, #tpu.memory_space<vmem>>, %arg2: memref<6x5xf32, #tpu.memory_space<vmem>>) attributes {dimension_semantics = [], scalar_prefetch = 0 : i64, scratch_operands = 0 : i64, tpu.core_type = #tpu.core_type<tc>} {
    %c0 = arith.constant 0 : index
    %c0_0 = arith.constant 0 : index
    %0 = vector.load %arg0[%c0, %c0_0] : memref<8x4xf32, #tpu.memory_space<vmem>>, vector<8x4xf32>
    %c0_1 = arith.constant 0 : index
    %c0_2 = arith.constant 0 : index
    %1 = vector.load %arg1[%c0_1, %c0_2] : memref<48x128xf32, #tpu.memory_space<vmem>>, vector<4x4xf32>
    %c8 = arith.constant 8 : index
    %c0_3 = arith.constant 0 : index
    %2 = vector.load %arg1[%c8, %c0_3] : memref<48x128xf32, #tpu.memory_space<vmem>>, vector<4x18xf32>
    %c16 = arith.constant 16 : index
    %c0_4 = arith.constant 0 : index
    %3 = vector.load %arg1[%c16, %c0_4] : memref<48x128xf32, #tpu.memory_space<vmem>>, vector<18x2xf32>
    %c40 = arith.constant 40 : index
    %c0_5 = arith.constant 0 : index
    %4 = vector.load %arg1[%c40, %c0_5] : memref<48x128xf32, #tpu.memory_space<vmem>>, vector<1x6xf32>
    %c41 = arith.constant 41 : index
    %c0_6 = arith.constant 0 : index
    %5 = vector.load %arg1[%c41, %c0_6] : memref<48x128xf32, #tpu.memory_space<vmem>>, vector<1x4xf32>
    %c42 = arith.constant 42 : index
    %c0_7 = arith.constant 0 : index
    %6 = vector.load %arg1[%c42, %c0_7] : memref<48x128xf32, #tpu.memory_space<vmem>>, vector<1x18xf32>
    %c43 = arith.constant 43 : index
    %c0_8 = arith.constant 0 : index
    %7 = vector.load %arg1[%c43, %c0_8] : memref<48x128xf32, #tpu.memory_space<vmem>>, vector<1x2xf32>
    %c44 = arith.constant 44 : index
    %c0_9 = arith.constant 0 : index
    %8 = vector.load %arg1[%c44, %c0_9] : memref<48x128xf32, #tpu.memory_space<vmem>>, vector<1x6xf32>
    %cst = arith.constant dense<0.000000e+00> : vector<8x4xf32>
    %9 = tpu.matmul %0, %1, %cst {dimension_numbers = #tpu.dot_dimension_numbers<[1], [0], [0], [1], [0, 0, 1, 1], [], []>} : vector<8x4xf32>, vector<4x4xf32>, vector<8x4xf32> -> vector<8x4xf32>
    %10 = vector.broadcast %5 : vector<1x4xf32> to vector<8x4xf32>
    %11 = arith.addf %9, %10 : vector<8x4xf32>
    %cst_10 = arith.constant 0.000000e+00 : f32
    %12 = vector.broadcast %cst_10 : f32 to vector<8x4xf32>
    %13 = arith.maximumf %11, %12 : vector<8x4xf32>
    %cst_11 = arith.constant dense<0.000000e+00> : vector<8x18xf32>
    %14 = tpu.matmul %13, %2, %cst_11 {dimension_numbers = #tpu.dot_dimension_numbers<[1], [0], [0], [1], [0, 0, 1, 1], [], []>} : vector<8x4xf32>, vector<4x18xf32>, vector<8x18xf32> -> vector<8x18xf32>
    %15 = vector.broadcast %6 : vector<1x18xf32> to vector<8x18xf32>
    %16 = arith.addf %14, %15 : vector<8x18xf32>
    %cst_12 = arith.constant 0.000000e+00 : f32
    %17 = vector.broadcast %cst_12 : f32 to vector<8x18xf32>
    %18 = arith.maximumf %16, %17 : vector<8x18xf32>
    %cst_13 = arith.constant dense<0.000000e+00> : vector<8x2xf32>
    %19 = tpu.matmul %18, %3, %cst_13 {dimension_numbers = #tpu.dot_dimension_numbers<[1], [0], [0], [1], [0, 0, 1, 1], [], []>} : vector<8x18xf32>, vector<18x2xf32>, vector<8x2xf32> -> vector<8x2xf32>
    %20 = vector.broadcast %7 : vector<1x2xf32> to vector<8x2xf32>
    %21 = arith.addf %19, %20 : vector<8x2xf32>
    %cst_14 = arith.constant dense<0xFF800000> : vector<8xf32>
    %22 = vector.multi_reduction <maximumf>, %21, %cst_14 [1] : vector<8x2xf32> to vector<8xf32>
    %23 = vector.shape_cast %22 : vector<8xf32> to vector<8x1xf32>
    %24 = vector.extract_strided_slice %23 {offsets = [0, 0], sizes = [7, 1], strides = [1, 1]} : vector<8x1xf32> to vector<7x1xf32>
    %25 = vector.extract_strided_slice %23 {offsets = [1, 0], sizes = [7, 1], strides = [1, 1]} : vector<8x1xf32> to vector<7x1xf32>
    %26 = arith.maximumf %24, %25 : vector<7x1xf32>
    %27 = vector.broadcast %26 : vector<7x1xf32> to vector<7x6xf32>
    %28 = vector.broadcast %4 : vector<1x6xf32> to vector<7x6xf32>
    %29 = arith.mulf %27, %28 : vector<7x6xf32>
    %30 = vector.broadcast %8 : vector<1x6xf32> to vector<7x6xf32>
    %31 = arith.addf %29, %30 : vector<7x6xf32>
    %32 = vector.extract_strided_slice %31 {offsets = [0, 0], sizes = [7, 5], strides = [1, 1]} : vector<7x6xf32> to vector<7x5xf32>
    %33 = vector.extract_strided_slice %31 {offsets = [0, 1], sizes = [7, 5], strides = [1, 1]} : vector<7x6xf32> to vector<7x5xf32>
    %34 = arith.maximumf %32, %33 : vector<7x5xf32>
    %35 = vector.extract_strided_slice %34 {offsets = [0, 0], sizes = [6, 5], strides = [1, 1]} : vector<7x5xf32> to vector<6x5xf32>
    %36 = vector.extract_strided_slice %34 {offsets = [1, 0], sizes = [6, 5], strides = [1, 1]} : vector<7x5xf32> to vector<6x5xf32>
    %37 = arith.maximumf %35, %36 : vector<6x5xf32>
    %c0_15 = arith.constant 0 : index
    %c0_16 = arith.constant 0 : index
    %38 = vector.load %arg2[%c0_15, %c0_16] : memref<6x5xf32, #tpu.memory_space<vmem>>, vector<6x5xf32>
    tpu.vector_store %arg2[%c0_15, %c0_16], %37 {strides = array<i32>} : memref<6x5xf32, #tpu.memory_space<vmem>>, vector<6x5xf32>,
    return
  }
}

</mosaic_0001>

<bundles_post_ra>
// kernel: tpu_custom_call.1
= control target key start
LH: loop header
LB: loop body
LE: loop exit
PB: predicated region body
PF: predicated region fallthrough
CT: control target
= control target key end

     0   :  { %7 = vsyncpa [#allocation3], 0  ;;  %s484_s0 = inlined_call_operand.vmem [shape: f32[8,4], index: 0, kind: input, shape index: {}]   ;;  %s485_s1 = inlined_call_operand.hbm [shape: f32[48,128], index: 1, kind: input, shape index: {}]   ;;  %s486_s2 = inlined_call_operand.hbm [shape: f32[6,5], index: 2, kind: output, shape index: {}]  }
   0x1   :  { %8 = vsyncpa [#allocation4], 0  ;;  %s431_s9 = smov [#allocation2]   ;;  %s383_s13 = scalar_lea.hbm %s485_s1, 768 }
   0x2   :  { %s16_s10 = sshll.u32 %s431_s9, 4  ;;  %p384_p0 = scmp.ne.s32.totalorder %s485_s1, %s383_s13  ;;  %s17_s10 = int_to_ptr.vmem [resolvable:$true] %s16_s10 }
   0x3   :  { %p387_p1 = scmp.lt.u32.totalorder %s383_s13, %s485_s1 }
   0x5   :  { %p389_p2 = pnand %p387_p1, %p384_p0 }
   0x7   :  { %392 = shalt.err (!%p389_p2)
}
   0x8   :  { %s393_s18 = scalar_lea.vmem %s17_s10, 768  ;;  %p398_p4 = scmp.lt.s32.totalorder %s17_s10, %s17_s10 }
   0x9   :  { %p394_p3 = scmp.ne.s32.totalorder %s17_s10, %s393_s18  ;;  %p399_p5 = scmp.lt.s32.totalorder %s393_s18, %s393_s18 }
   0xb   :  { %p400_p6 = por %p399_p5, %p398_p4 }
   0xd   :  { %p401_p7 = pnand %p400_p6, %p394_p3 }
   0xf   :  { %404 = shalt.err (!%p401_p7)
}
  0x10   :  { %s432_s19 = smov 128   ;;  %s433_s20 = smov 8  }
  0x11   :  { %22 = dma.hbm_to_vmem [thread:$0]  %s485_s1, 768, %s17_s10, [#allocation3], %s432_s19, %s432_s19, %s433_s20  }
  0x12   :  { %427 = dma.done.wait [#allocation3], 768  }
  0x13   :  { %428 = vsyncadd [#allocation3], 4294966528  ;;  %v434_v0 = vmov 0.0   ;;  %vm435_vm0 = vmmov 0   ;;  %vm45_vm1 = vcmask 1043456   ;;  %vm41_vm2 = vcmask 31744  }
  0x14   :  { %351 = vmatprep.subr.mxu1 %v434_v0  ;;  %353 = vmatprep.mubr.msk.f32.mxu1 %vm435_vm0, %v434_v0  ;;  %v27_v1 = vld [vmem:[#allocation2] sm:$0xf]  ;;  %v28_v3 = vld [vmem:[#allocation2 + $0x8] sm:$0xf]  ;;  %v436_v4 = vmov 0.0|0.0   ;;  %v29_v10 = vld [vmem:[#allocation2 + $0x10] sm:$0xff] }
  0x15   :  { %367 = vmatprep.mubr.msk.f32.mxu0 %vm435_vm0, %v434_v0  ;;  %v26_v2 = vld [vmem:[%s484_s0] sm:$0xff]  ;;  %352 = vmatpush3.msk.msra.mxu1 %vm45_vm1, %v27_v1  ;;  %v332_v5 = vld [vmem:[#allocation2 + $0x29] ss:$0 sm:$0xff]  ;;  %v30_v11 = vld [vmem:[#allocation2 + $0x18] sm:$0xff]  ;;  %vm209_vm3 = vcmask 1041408   ;;  %vm205_vm4 = vcmask 146432  }
  0x16   :  { %354 = vmatmul.mubr.msk.f32.vlgmr.msra.gmra.mrb[0].mxu1 %vm41_vm2, %v26_v2  ;;  %356 = vmatprep.subr.mxu1 %v434_v0  ;;  %v371_v12 = vpack.c.bf16 %v30_v11, %v29_v10  ;;  %v31_v13 = vld [vmem:[#allocation2 + $0x20] sm:$0x3]  ;;  %v335_v14 = vld [vmem:[#allocation2 + $0x2a] ss:$0 sm:$0xff]  ;;  %v338_v19 = vld [vmem:[#allocation2 + $0x2b] ss:$0 sm:$0xff] }
  0x17   :  { %358 = vmatprep.mubr.msk.f32.mxu1 %vm435_vm0, %v434_v0  ;;  %357 = vmatpush3.msk.msra.mxu1 %vm45_vm1, %v28_v3  ;;  %vm283_vm5 = vcmask 15360   ;;  %v437_v24 = vmov 0   ;;  %v341_v28 = vld [vmem:[#allocation2 + $0x28] ss:$0 sm:$0xff]  ;;  %v342_v30 = vld [vmem:[#allocation2 + $0x2c] ss:$0 sm:$0xff] }
  0x18   :  { %370 = vmatprep.subr.bf16.mxu0 %v436_v4  ;;  %382 = vset.pattern.permute.xlu0 %v437_v24  ;;  %s438_s0 = smov 127   ;;  %s439_s1 = smov [#allocation5]   ;;  %vm315_vm6 = vcmask 37888  }
  0x19   :  { %372 = vmatpush3.bf16.msra.mxu0 %v371_v12  ;;  %s323_s25 = sshll.u32 %s439_s1, 4  ;;  %s324_s25 = int_to_ptr.vmem [resolvable:$true] %s323_s25 }
  0x1a   :  { %365 = vmatprep.subr.mxu0 %v434_v0  ;;  %s405_s26 = scalar_lea.vmem %s324_s25, 128  ;;  %p410_p9 = scmp.lt.s32.totalorder %s324_s25, %s324_s25 }
  0x1b   :  { %p406_p8 = scmp.ne.s32.totalorder %s324_s25, %s405_s26  ;;  %p411_p10 = scmp.lt.s32.totalorder %s405_s26, %s405_s26 }
  0x1d   :  { %366 = vmatpush3.msk.msra.mxu0 %vm209_vm3, %v31_v13  ;;  %p412_p11 = por %p411_p10, %p410_p9 }
  0x1f   :  { %p413_p12 = pnand %p412_p11, %p406_p8 }
  0xe9   :  { %v115_v6 = vpop.f32.mrb[0].mxu1 }
  0xea   :  { %v116_v7 = vadd.f32 %v332_v5, %v115_v6  ;;  %v355_v8 = vpop.f32.mrb[1].mxu1 }
  0xec   :  { %v119_v9 = vmax.f32 %v116_v7, 0.0 }
  0xee   :  { %359 = vmatmul.mubr.msk.f32.vlgmr.msra.gmra.mrb[2].mxu1 %vm41_vm2, %v119_v9 }
 0x1c1   :  { %v196_v15 = vpop.f32.mrb[2].mxu1 }
 0x1c2   :  { %v197_v16 = vadd.f32 %v335_v14, %v196_v15  ;;  %v360_v17 = vpop.f32.mrb[3].mxu1 }
 0x1c4   :  { %v200_v18 = vmax.f32 %v197_v16, 0.0 }
 0x1c6   :  { %368 = vmatmul.mubr.msk.f32.vlgmr.msra.gmra.mrb[0].mxu0 %vm205_vm4, %v200_v18 }
 0x299   :  { %v279_v20 = vpop.f32.mrb[0].mxu0 }
 0x29a   :  { %v280_v21 = vadd.f32 %v338_v19, %v279_v20  ;;  %v369_v22 = vpop.f32.mrb[1].mxu0 }
 0x29c   :  { %v284_v23 = vsel %vm283_vm5, %v280_v21, -inf }
 0x29d   :  { %285 = vmax.xlane.f32.xlu0 %v284_v23 }
 0x32a   :  { %v286_v25 = vpop.xlane.xlu0 %285 }
 0x32b   :  { %v288_v26 = vrot.slane %v286_v25, 1 }
 0x32d   :  { %v290_v27 = vmax.f32 %v286_v25, %v288_v26 }
 0x32f   :  { %293 = vperm.xlu0 %382, %v290_v27  }
 0x3ae   :  { %v294_v29 = vpop.permute.xlu0 %293 }
 0x3af   :  { %v300_v31 = vmul.f32 %v341_v28, %v294_v29 }
 0x3b1   :  { %v305_v32 = vadd.f32 %v342_v30, %v300_v31 }
 0x3b3   :  { %307 = vrot.lane.b32.xlu1 %v305_v32, %s438_s0 }
 0x425   :  { %v308_v33 = vpop.permute.xlu1 %307 }
 0x426   :  { %v310_v34 = vmax.f32 %v305_v32, %v308_v33 }
 0x428   :  { %v312_v35 = vrot.slane %v310_v34, 1 }
 0x42a   :  { %v314_v36 = vmax.f32 %v310_v34, %v312_v35 }
 0x42c   :  { %316 = vst.msk [vmem:[#allocation5] sm:$0x3f] %vm315_vm6, %v314_v36 }
 0x42d   :  { %416 = shalt.err (!%p413_p12)
}
 0x42e   :  { %s417_s29 = scalar_lea.hbm %s486_s2, 128 }
 0x42f   :  { %p418_p13 = scmp.ne.s32.totalorder %s486_s2, %s417_s29  ;;  %p421_p0 = scmp.lt.u32.totalorder %s417_s29, %s486_s2 }
 0x431   :  { %p423_p1 = pnand %p421_p0, %p418_p13 }
 0x433   :  { %426 = shalt.err (!%p423_p1)
}
 0x434   :  { %326 = dma.vmem_to_hbm [thread:$0]  %s324_s25, 128, %s486_s2, [#allocation4]  }
 0x435   :  { %429 = dma.done.wait [#allocation4], 128  }
 0x436   :  { %430 = vsyncadd [#allocation4], 4294967168 }
 0x437   :  { %330 = vsyncpa [#allocation3], 1 }
 0x438   :  { %331 = vsyncpa [#allocation4], 1 }

</bundles_post_ra>
